<compile_context>
chip_gen: v7x
topology: tpu7x:2x2x1
jax: 0.10.0
libtpu: 0.0.40
codegen_flags: <defaults>
</compile_context>

<pallas_src>
import jax
import jax.numpy as jnp
from jax.experimental import pallas as pl
from jax.experimental.pallas import tpu as pltpu

_LANE = 128
_SUBLANE = 8  # f32 sublane granularity


def _round_up(x, m):
    return ((x + m - 1) // m) * m


def _vmem_estimate(tile, d0, d1, d2):
    """Rough per-call VMEM footprint (bytes), including lane padding to 128."""
    pad = lambda d: max(_round_up(d, _LANE), _LANE)
    x_blk = 2 * tile * pad(d0) * 4                 # double-buffered f32 input block
    acts = tile * (pad(d1) + pad(d2)) * 4          # f32 hidden activations
    out_blk = 2 * max(_round_up(tile, _LANE), _LANE) * 4
    weights = 2 * (pad(d0) * pad(d1) + pad(d1) * pad(d2) + 3 * pad(d2)) * 4
    return x_blk + acts + out_blk + weights


def _mlp_kernel(x_ref, w0_ref, b0_ref, w1_ref, b1_ref, w2_ref, b2_ref, o_ref):
    """Fused 3-layer MLP for one batch tile.

    x_ref:  (TB, D0)   f32 (cast to matmul dtype in-kernel — free on the VPU)
    w0_ref: (D0, D1)   compute dtype     b0_ref: (1, D1) f32
    w1_ref: (D1, D2)   compute dtype     b1_ref: (1, D2) f32
    w2_ref: (1,  D2)   f32 (final layer stored as a row)
    b2_ref: (1,)       f32 in SMEM (scalar)
    o_ref:  (1, 1, TB) f32 — lane-dense output (batch on the lane axis)
    """
    x = x_ref[...].astype(w0_ref.dtype)
    # Layer 0: MXU matmul with f32 accumulation, bias + ReLU in f32 on the VPU.
    h = jnp.dot(x, w0_ref[...], preferred_element_type=jnp.float32)
    h = jnp.maximum(h + b0_ref[...], 0.0)
    # Layer 1.
    h = jnp.dot(h.astype(w1_ref.dtype), w1_ref[...],
                preferred_element_type=jnp.float32)
    h = jnp.maximum(h + b1_ref[...], 0.0)                      # (TB, D2) f32
    # Layer 2 (D2 -> 1): VPU multiply + cross-lane (XLU) reduce instead of a
    # wasteful N=1 systolic matmul.
    y = jnp.sum(h * w2_ref[...], axis=-1)                      # (TB,)
    y = y[None, :] + b2_ref[0]                                  # (1, TB) lane-dense
    o_ref[...] = y[None].astype(o_ref.dtype)                    # (1, 1, TB)


def individual_net_forward(x, params, *, batch_tile=4096,
                           compute_dtype=jnp.float32,
                           vmem_budget_bytes=24 * 1024 * 1024):
    """Run IndividualNet.forward via a single fused Pallas kernel.

    x:       (B, in_dim) float32
    params:  dict with w0 (D0,D1), b0 (1,D1), w1 (D1,D2), b1 (1,D2),
             w2 (D2,1), b2 (1,1)     (PyTorch Linear weights, transposed)
    returns: (B, 1) float32
    """
    B, D0 = x.shape
    w0, b0 = params["w0"], params["b0"]
    w1, b1 = params["w1"], params["b1"]
    w2, b2 = params["w2"], params["b2"]
    D1 = w0.shape[1]
    D2 = w1.shape[1]

    # --- Tile selection -----------------------------------------------------
    # Big tiles amortize the per-grid-step overhead (the kernel is HBM/step
    # bound, not MXU bound); shrink until the VMEM estimate fits the budget.
    align = _SUBLANE
    tile = min(_round_up(batch_tile, align), _round_up(B, align))
    while tile > align and _vmem_estimate(tile, D0, D1, D2) > vmem_budget_bytes:
        tile = _round_up(tile // 2, align)
    # Give a 2-TC chip (v7x) two blocks to shard across its cores, but only
    # when the single tile is already big enough that an extra step is free.
    if pl.cdiv(B, tile) == 1 and tile >= 2048:
        tile = _round_up(pl.cdiv(B, 2), align)
    num_tiles = pl.cdiv(B, tile)

    # No jnp.pad: Pallas clips the DMA of the ragged last input block; the
    # overhang rows compute garbage that is sliced off below (rows are
    # independent, so no cross-row contamination).
    w0_in = w0.astype(compute_dtype)
    w1_in = w1.astype(compute_dtype)
    b0_in = b0.reshape(1, D1).astype(jnp.float32)
    b1_in = b1.reshape(1, D2).astype(jnp.float32)
    w2_row = w2.reshape(1, D2).astype(jnp.float32)   # final layer as a row
    b2_in = b2.reshape(1).astype(jnp.float32)        # scalar bias -> SMEM

    # Small constant operands: single resident VMEM block across the grid.
    def const_spec(shape):
        return pl.BlockSpec(shape, lambda i: tuple(0 for _ in shape))

    out = pl.pallas_call(
        _mlp_kernel,
        out_shape=jax.ShapeDtypeStruct((num_tiles, 1, tile), jnp.float32),
        grid_spec=pltpu.PrefetchScalarGridSpec(
            num_scalar_prefetch=0,
            grid=(num_tiles,),
            in_specs=[
                pl.BlockSpec((tile, D0), lambda i: (i, 0)),          # x tile (f32)
                const_spec((D0, D1)),                                # w0
                const_spec((1, D1)),                                 # b0
                const_spec((D1, D2)),                                # w1
                const_spec((1, D2)),                                 # b1
                const_spec((1, D2)),                                 # w2 row
                pl.BlockSpec(memory_space=pltpu.MemorySpace.SMEM),   # b2 scalar
            ],
            out_specs=pl.BlockSpec((1, 1, tile), lambda i: (i, 0, 0)),
        ),
        compiler_params=pltpu.CompilerParams(
            dimension_semantics=("parallel",),
            vmem_limit_bytes=48 * 1024 * 1024,
        ),
    )(x.astype(jnp.float32), w0_in, b0_in, w1_in, b1_in, w2_row, b2_in)

    return out.reshape(num_tiles * tile, 1)[:B]


def init_params(key, ndim):
    """Deterministic init mimicking nn.Linear's U(-1/sqrt(fan_in), 1/sqrt(fan_in))."""
    dims = list(ndim) + [1]  # MainNet appends Linear(ndim[-1], 1)
    params = {}
    keys = jax.random.split(key, 2 * (len(dims) - 1))
    for li in range(len(dims) - 1):
        fan_in, fan_out = dims[li], dims[li + 1]
        bound = 1.0 / (fan_in ** 0.5)
        wk, bk = keys[2 * li], keys[2 * li + 1]
        params[f"w{li}"] = jax.random.uniform(
            wk, (fan_in, fan_out), jnp.float32, -bound, bound)
        params[f"b{li}"] = jax.random.uniform(
            bk, (1, fan_out), jnp.float32, -bound, bound)
    return params


def _reference_forward(x, params):
    h = jnp.maximum(x @ params["w0"] + params["b0"], 0.0)
    h = jnp.maximum(h @ params["w1"] + params["b1"], 0.0)
    return h @ params["w2"] + params["b2"]


if __name__ == "__main__":
    # IndividualNet(ndim=[32, 64, 32]):
    #   Linear(32,64)+ReLU, Linear(64,32)+ReLU, Linear(32,1)
    # TODO(synk): only the forward pass is implemented; fit/train_val_split/
    #             DataLoader/Yogi-optimizer training loop is host-side logic.
    ndim = [32, 64, 32]

    key = jax.random.PRNGKey(0)
    kp, kx = jax.random.split(key)
    params = init_params(kp, ndim)

    # batch=8 exercises the single-tile path with default tiling;
    # batch=40 with batch_tile=16 exercises the ragged partial-last-block path
    # (grid=3, last block only half full, no wrapper-side padding).
    for batch, tile_cap in ((8, 4096), (40, 16)):
        x = jax.random.normal(jax.random.fold_in(kx, batch),
                              (batch, ndim[0]), dtype=jnp.float32)
        y_ref = _reference_forward(x, params)

        # Default path: f32 end-to-end, bit-exact.
        y32 = jax.block_until_ready(
            individual_net_forward(x, params, batch_tile=tile_cap))
        assert y32.shape == (batch, 1)
        assert jnp.allclose(y32, y_ref, atol=1e-5, rtol=1e-5)

        # Optional bf16 MXU-feed path (f32 accumulation), cast done in-kernel.
        ybf = jax.block_until_ready(
            individual_net_forward(x, params, batch_tile=tile_cap,
                                   compute_dtype=jnp.bfloat16))
        assert ybf.shape == (batch, 1)
        assert jnp.allclose(ybf, y_ref, atol=2e-2, rtol=2e-2)

    print("KERNEL_OK")
</pallas_src>

<mosaic_0001>
module attributes {stable_mosaic.version = 11 : i64} {
  func.func @_mlp_kernel(%arg0: i32, %arg1: memref<8x32xf32, #tpu.memory_space<vmem>>, %arg2: memref<32x64xf32, #tpu.memory_space<vmem>>, %arg3: memref<1x64xf32, #tpu.memory_space<vmem>>, %arg4: memref<64x32xf32, #tpu.memory_space<vmem>>, %arg5: memref<1x32xf32, #tpu.memory_space<vmem>>, %arg6: memref<1x32xf32, #tpu.memory_space<vmem>>, %arg7: memref<1xf32, #tpu.memory_space<smem>>, %arg8: memref<1x1x8xf32, #tpu.memory_space<vmem>>) attributes {dimension_semantics = [#tpu.dimension_semantics<parallel>], iteration_bounds = array<i64: 1>, scalar_prefetch = 0 : i64, scratch_operands = 0 : i64, tpu.core_type = #tpu.core_type<tc>, window_params = [{transform_indices = @transform_0, window_bounds = array<i64: 8, 32>}, {pipeline_mode = #tpu.pipeline_mode<synchronous>, transform_indices = @transform_1, window_bounds = array<i64: 32, 64>}, {pipeline_mode = #tpu.pipeline_mode<synchronous>, transform_indices = @transform_2, window_bounds = array<i64: 1, 64>}, {pipeline_mode = #tpu.pipeline_mode<synchronous>, transform_indices = @transform_3, window_bounds = array<i64: 64, 32>}, {pipeline_mode = #tpu.pipeline_mode<synchronous>, transform_indices = @transform_4, window_bounds = array<i64: 1, 32>}, {pipeline_mode = #tpu.pipeline_mode<synchronous>, transform_indices = @transform_5, window_bounds = array<i64: 1, 32>}, {transform_indices = @transform_6, window_bounds = array<i64: 1>}, {transform_indices = @transform_7, window_bounds = array<i64: 1, 1, 8>}]} {
    %c0 = arith.constant 0 : index
    %c0_0 = arith.constant 0 : index
    %0 = vector.load %arg1[%c0, %c0_0] : memref<8x32xf32, #tpu.memory_space<vmem>>, vector<8x32xf32>
    %c0_1 = arith.constant 0 : index
    %c0_2 = arith.constant 0 : index
    %1 = vector.load %arg2[%c0_1, %c0_2] : memref<32x64xf32, #tpu.memory_space<vmem>>, vector<32x64xf32>
    %cst = arith.constant dense<0.000000e+00> : vector<8x64xf32>
    %2 = tpu.matmul %0, %1, %cst {dimension_numbers = #tpu.dot_dimension_numbers<[1], [0], [0], [1], [0, 0, 1, 1], [], []>} : vector<8x32xf32>, vector<32x64xf32>, vector<8x64xf32> -> vector<8x64xf32>
    %c0_3 = arith.constant 0 : index
    %c0_4 = arith.constant 0 : index
    %3 = vector.load %arg3[%c0_3, %c0_4] : memref<1x64xf32, #tpu.memory_space<vmem>>, vector<1x64xf32>
    %4 = vector.broadcast %3 : vector<1x64xf32> to vector<8x64xf32>
    %5 = arith.addf %2, %4 : vector<8x64xf32>
    %cst_5 = arith.constant 0.000000e+00 : f32
    %6 = vector.broadcast %cst_5 : f32 to vector<8x64xf32>
    %7 = arith.maximumf %5, %6 : vector<8x64xf32>
    %c0_6 = arith.constant 0 : index
    %c0_7 = arith.constant 0 : index
    %8 = vector.load %arg4[%c0_6, %c0_7] : memref<64x32xf32, #tpu.memory_space<vmem>>, vector<64x32xf32>
    %cst_8 = arith.constant dense<0.000000e+00> : vector<8x32xf32>
    %9 = tpu.matmul %7, %8, %cst_8 {dimension_numbers = #tpu.dot_dimension_numbers<[1], [0], [0], [1], [0, 0, 1, 1], [], []>} : vector<8x64xf32>, vector<64x32xf32>, vector<8x32xf32> -> vector<8x32xf32>
    %c0_9 = arith.constant 0 : index
    %c0_10 = arith.constant 0 : index
    %10 = vector.load %arg5[%c0_9, %c0_10] : memref<1x32xf32, #tpu.memory_space<vmem>>, vector<1x32xf32>
    %11 = vector.broadcast %10 : vector<1x32xf32> to vector<8x32xf32>
    %12 = arith.addf %9, %11 : vector<8x32xf32>
    %cst_11 = arith.constant 0.000000e+00 : f32
    %13 = vector.broadcast %cst_11 : f32 to vector<8x32xf32>
    %14 = arith.maximumf %12, %13 : vector<8x32xf32>
    %c0_12 = arith.constant 0 : index
    %c0_13 = arith.constant 0 : index
    %15 = vector.load %arg6[%c0_12, %c0_13] : memref<1x32xf32, #tpu.memory_space<vmem>>, vector<1x32xf32>
    %16 = vector.broadcast %15 : vector<1x32xf32> to vector<8x32xf32>
    %17 = arith.mulf %14, %16 : vector<8x32xf32>
    %cst_14 = arith.constant dense<0.000000e+00> : vector<8xf32>
    %18 = vector.multi_reduction <add>, %17, %cst_14 [1] : vector<8x32xf32> to vector<8xf32>
    %19 = vector.shape_cast %18 : vector<8xf32> to vector<1x8xf32>
    %c0_15 = arith.constant 0 : index
    %20 = memref.load %arg7[%c0_15] : memref<1xf32, #tpu.memory_space<smem>>
    %21 = vector.broadcast %20 : f32 to vector<1x8xf32>
    %22 = arith.addf %19, %21 : vector<1x8xf32>
    %23 = vector.shape_cast %22 : vector<1x8xf32> to vector<1x1x8xf32>
    %c0_16 = arith.constant 0 : index
    %c0_17 = arith.constant 0 : index
    %c0_18 = arith.constant 0 : index
    %24 = vector.load %arg8[%c0_16, %c0_17, %c0_18] : memref<1x1x8xf32, #tpu.memory_space<vmem>>, vector<1x1x8xf32>
    tpu.vector_store %arg8[%c0_16, %c0_17, %c0_18], %23 {strides = array<i32>} : memref<1x1x8xf32, #tpu.memory_space<vmem>>, vector<1x1x8xf32>,
    return
  }
  func.func @transform_0(%arg0: i32) -> (i32, i32) {
    %c0_i32 = arith.constant 0 : i32
    %c0_i32_0 = arith.constant 0 : i32
    return %arg0, %c0_i32 : i32, i32
  }
  func.func @transform_1(%arg0: i32) -> (i32, i32) {
    %c0_i32 = arith.constant 0 : i32
    %c0_i32_0 = arith.constant 0 : i32
    %c0_i32_1 = arith.constant 0 : i32
    return %c0_i32, %c0_i32_0 : i32, i32
  }
  func.func @transform_2(%arg0: i32) -> (i32, i32) {
    %c0_i32 = arith.constant 0 : i32
    %c0_i32_0 = arith.constant 0 : i32
    %c0_i32_1 = arith.constant 0 : i32
    return %c0_i32, %c0_i32_0 : i32, i32
  }
  func.func @transform_3(%arg0: i32) -> (i32, i32) {
    %c0_i32 = arith.constant 0 : i32
    %c0_i32_0 = arith.constant 0 : i32
    %c0_i32_1 = arith.constant 0 : i32
    return %c0_i32, %c0_i32_0 : i32, i32
  }
  func.func @transform_4(%arg0: i32) -> (i32, i32) {
    %c0_i32 = arith.constant 0 : i32
    %c0_i32_0 = arith.constant 0 : i32
    %c0_i32_1 = arith.constant 0 : i32
    return %c0_i32, %c0_i32_0 : i32, i32
  }
  func.func @transform_5(%arg0: i32) -> (i32, i32) {
    %c0_i32 = arith.constant 0 : i32
    %c0_i32_0 = arith.constant 0 : i32
    %c0_i32_1 = arith.constant 0 : i32
    return %c0_i32, %c0_i32_0 : i32, i32
  }
  func.func @transform_6(%arg0: i32) -> i32 {
    %c0_i32 = arith.constant 0 : i32
    %c0_i32_0 = arith.constant 0 : i32
    return %c0_i32 : i32
  }
  func.func @transform_7(%arg0: i32) -> (i32, i32, i32) {
    %c0_i32 = arith.constant 0 : i32
    %c0_i32_0 = arith.constant 0 : i32
    %c0_i32_1 = arith.constant 0 : i32
    return %arg0, %c0_i32, %c0_i32_0 : i32, i32, i32
  }
}

</mosaic_0001>

<bundles_post_ra>
// kernel: tpu_custom_call.1
= control target key start
LH: loop header
LB: loop body
LE: loop exit
PB: predicated region body
PF: predicated region fallthrough
CT: control target
= control target key end

     0   :  { %v338_v3 = vmov 0.0|0.0   ;;  %vm339_vm0 = vmmov 0   ;;  %v340_v6 = vmov 0.0   ;;  %s447_s0 = inlined_call_operand.vmem [shape: f32[8,32], index: 0, kind: input, shape index: {}]   ;;  %s448_s1 = inlined_call_operand.vmem [shape: f32[32,64], index: 1, kind: input, shape index: {}]   ;;  %s449_s2 = inlined_call_operand.vmem [shape: f32[1,64], index: 2, kind: input, shape index: {}]   ;;  %s450_s3 = inlined_call_operand.vmem [shape: f32[64,32], index: 3, kind: input, shape index: {}]   ;;  %s451_s4 = inlined_call_operand.vmem [shape: f32[1,32], index: 4, kind: input, shape index: {}]   ;;  %s452_s5 = inlined_call_operand.vmem [shape: f32[1,32], index: 5, kind: input, shape index: {}]   ;;  %s453_s6 = inlined_call_operand.<no memory space> [shape: f32[1], index: 6, kind: input, shape index: {}]   ;;  %s454_s7 = inlined_call_operand.hbm [shape: f32[1,1,8], index: 7, kind: output, shape index: {}]  }
   0x1   :  { %v29_v0 = vld [vmem:[%s448_s1] sm:$0xff]  ;;  %v30_v1 = vld [vmem:[%s448_s1 + $0x8] sm:$0xff]  ;;  %v31_v2 = vld [vmem:[%s448_s1 + $0x10] sm:$0xff]  ;;  %292 = vmatprep.subr.bf16.mxu0 %v338_v3  ;;  %270 = vmatprep.mubr.msk.f32.mxu0 %vm339_vm0, %v340_v6 }
   0x2   :  { %v293_v4 = vpack.c.bf16 %v30_v1, %v29_v0  ;;  %v32_v5 = vld [vmem:[%s448_s1 + $0x18] sm:$0xff]  ;;  %v115_v7 = vld [vmem:[%s450_s3] sm:$0xff]  ;;  %298 = vmatprep.subr.bf16.mxu1 %v338_v3  ;;  %v116_v8 = vld [vmem:[%s450_s3 + $0x8] sm:$0xff]  ;;  %289 = vmatprep.mubr.msk.f32.mxu1 %vm339_vm0, %v340_v6 }
   0x3   :  { %v117_v9 = vld [vmem:[%s450_s3 + $0x10] sm:$0xff]  ;;  %v118_v10 = vld [vmem:[%s450_s3 + $0x18] sm:$0xff]  ;;  %v296_v11 = vpack.c.bf16 %v32_v5, %v31_v2  ;;  %v299_v12 = vpack.c.bf16 %v116_v8, %v115_v7 }
   0x4   :  { %294 = vmatpush3.bf16.msra.mxu0 %v293_v4 }
   0x5   :  { %295 = vmatprep.subr.bf16.mxu0 %v338_v3 }
   0x6   :  { %13 = vsyncpa [#allocation4], 0  ;;  %300 = vmatpush3.bf16.msra.mxu1 %v299_v12  ;;  %v302_v13 = vpack.c.bf16 %v118_v10, %v117_v9  ;;  %v119_v14 = vld [vmem:[%s450_s3 + $0x20] sm:$0xff]  ;;  %v120_v15 = vld [vmem:[%s450_s3 + $0x28] sm:$0xff]  ;;  %vm40_vm1 = vcmask 261120   ;;  %vm130_vm2 = vcmask 523264   ;;  %v220_v34 = vlaneseq }
   0x7   :  { %301 = vmatprep.subr.bf16.mxu1 %v338_v3  ;;  %v28_v16 = vld [vmem:[%s447_s0] sm:$0xff]  ;;  %v305_v17 = vpack.c.bf16 %v120_v15, %v119_v14  ;;  %v121_v18 = vld [vmem:[%s450_s3 + $0x30] sm:$0xff]  ;;  %v122_v19 = vld [vmem:[%s450_s3 + $0x38] sm:$0xff]  ;;  %v217_v37 = vstv %s453_s6  ;;  %vm227_vm3 = vcmask 57344  }
   0x8   :  { %297 = vmatpush3.bf16.msra.mxu0 %v296_v11  ;;  %v308_v20 = vpack.c.bf16 %v122_v19, %v121_v18  ;;  %v243_v21 = vld [vmem:[%s449_s2] ss:$0 sm:$0xff]  ;;  %v221_v35 = vand.u32 127, %v220_v34  ;;  %v223_v36 = vshrl.u32 %v220_v34, 7 }
   0x9   :  { %v245_v26 = vld [vmem:[%s451_s4] ss:$0 sm:$0xff]  ;;  %s341_s4 = smov [#allocation3]  }
   0xa   :  { %303 = vmatpush3.bf16.msra.mxu1 %v302_v13  ;;  %v247_v30 = vld [vmem:[%s452_s5] ss:$0 sm:$0xff]  ;;  %v224_v38 = vsub.s32 %v221_v35, %v223_v36  ;;  %s235_s8 = sshll.u32 %s341_s4, 4  ;;  %s236_s8 = int_to_ptr.vmem [resolvable:$true] %s235_s8 }
   0xb   :  { %271 = vmatmul.mubr.msk.f32.vlgmr.msra.gmra.mrb[0].mxu0 %vm40_vm1, %v28_v16  ;;  %304 = vmatprep.subr.bf16.mxu1 %v338_v3  ;;  %s314_s5 = scalar_lea.vmem %s236_s8, 16  ;;  %s318_s9 = scalar_lea.vmem %s236_s8, 32 }
   0xc   :  { %p315_p0 = scmp.ne.s32.totalorder %s236_s8, %s314_s5  ;;  %p319_p1 = scmp.lt.s32.totalorder %s236_s8, %s236_s8 }
   0xd   :  { %p320_p2 = scmp.lt.s32.totalorder %s318_s9, %s314_s5 }
   0xe   :  { %306 = vmatpush3.bf16.msra.mxu1 %v305_v17 }
   0xf   :  { %307 = vmatprep.subr.bf16.mxu1 %v338_v3  ;;  %p321_p3 = por %p320_p2, %p319_p1 }
  0x11   :  { %p322_p4 = pnand %p321_p3, %p315_p0 }
  0x12   :  { %309 = vmatpush3.bf16.msra.mxu1 %v308_v20 }
  0xde   :  { %v110_v22 = vpop.f32.mrb[0].mxu0 }
  0xdf   :  { %v111_v23 = vadd.f32 %v243_v21, %v110_v22  ;;  %v272_v24 = vpop.f32.mrb[1].mxu0 }
  0xe1   :  { %v114_v25 = vmax.f32 %v111_v23, 0.0 }
  0xe3   :  { %290 = vmatmul.mubr.msk.f32.vlgmr.msra.gmra.mrb[0].mxu1 %vm130_vm2, %v114_v25 }
 0x1b6   :  { %v200_v27 = vpop.f32.mrb[0].mxu1 }
 0x1b7   :  { %v201_v28 = vadd.f32 %v245_v26, %v200_v27  ;;  %v291_v29 = vpop.f32.mrb[1].mxu1 }
 0x1b9   :  { %v204_v31 = vmax.f32 %v201_v28, 0.0 }
 0x1bb   :  { %v212_v32 = vmul.f32 %v247_v30, %v204_v31 }
 0x1bd   :  { %v213_v33 = vsel %vm40_vm1, %v212_v32, 0.0 }
 0x1be   :  { %214 = vadd.xlane.f32.xlu0 %v213_v33 }
 0x24b   :  { %v215_v39 = vpop.xlane.xlu0 %214 }
 0x24c   :  { %v218_v40 = vadd.f32 %v217_v37, %v215_v39 }
 0x24e   :  { %v225_v41 = vrot.slane %v218_v40, %v224_v38 }
 0x250   :  { %228 = vst.msk [vmem:[#allocation3] sm:$0x1] %vm227_vm3, %v225_v41 }
 0x251   :  { %325 = shalt.err (!%p322_p4)
}
 0x252   :  { %s326_s6 = scalar_lea.hbm %s454_s7, 16 }
 0x253   :  { %p327_p5 = scmp.ne.s32.totalorder %s454_s7, %s326_s6  ;;  %p330_p6 = scmp.lt.u32.totalorder %s326_s6, %s454_s7 }
 0x255   :  { %p332_p7 = pnand %p330_p6, %p327_p5 }
 0x257   :  { %335 = shalt.err (!%p332_p7)
}
 0x258   :  { %238 = dma.vmem_to_hbm [thread:$0]  %s236_s8, 16, %s454_s7, [#allocation4]  }
 0x259   :  { %336 = dma.done.wait [#allocation4], 16  }
 0x25a   :  { %337 = vsyncadd [#allocation4], 4294967280 }
 0x25b   :  { %242 = vsyncpa [#allocation4], 1 }

</bundles_post_ra>
